<compile_context>
chip_gen: v7x
topology: tpu7x:2x2x1
jax: 0.10.0
libtpu: 0.0.40
codegen_flags: <defaults>
</compile_context>

<pallas_src>
import math

import jax
import jax.numpy as jnp
from jax import lax
from jax.experimental import pallas as pl
from jax.experimental.pallas import tpu as pltpu


def _sine_embedding_kernel(x_ref, fs_ref, wt_ref, b_ref, o_ref):
    # x_ref : (1, tm)          lane-dense row of inputs
    # fs_ref: (n, 1)           frequencies (resident)
    # wt_ref: (n, hidden_p)    W^T, zero-padded on lanes (resident)
    # b_ref : (1, hidden_p)    bias, zero-padded (resident)
    # o_ref : (tm, hidden_p)   lane-dense output tile
    x_row = x_ref[...]                                  # (1, tm)
    # (n,1)*(1,tm) -> (n,tm): pure sublane/lane broadcasts, no relayout.
    st = jnp.sin(fs_ref[...] * x_row)                   # (n, tm)  — EUP sin
    # "TN" matmul: contract dim 0 of both operands -> (tm, hidden_p) on MXU.
    acc = lax.dot_general(
        st, wt_ref[...],
        dimension_numbers=(((0,), (0,)), ((), ())),
        preferred_element_type=jnp.float32)             # f32 accumulation
    o_ref[...] = (acc + b_ref[...]).astype(o_ref.dtype)


def _round_up(v, a):
    return ((v + a - 1) // a) * a


def _auto_block_m(m, n, hidden_p, out_bytes, requested=None):
    """Pick a 128-multiple row tile that fits VMEM and keeps >=2 grid steps."""
    if m <= 128:
        return m                    # single full-extent block (constraint escape)
    target = 4096 if requested is None else requested
    # Per-row VMEM bytes: out double-buffer + x double-buffer + f32 sT + f32 acc.
    per_row = 2 * hidden_p * out_bytes + 2 * 4 + 4 * n + 4 * hidden_p
    fixed = 4 * n * hidden_p + 512 * n + 4 * hidden_p   # resident W^T, fs, bias
    budget = 12 * 1024 * 1024       # fits v5e's 16 MiB default scoped VMEM
    bm_budget = max(128, (budget - fixed) // per_row)
    bm_two_steps = _round_up(pl.cdiv(m, 2), 128)        # both v7x TCs get work
    bm = min(target, bm_budget, bm_two_steps, _round_up(m, 128))
    return max(128, (bm // 128) * 128)


def sine_embedding(x, fs, w, b, *, block_m=None, out_dtype=jnp.bfloat16):
    """Pallas implementation of SineEmbedding.forward.

    out[..., h] = sum_k sin(x[...] * fs[k]) * w[h, k] + b[h]

    Args:
      x:  float array of arbitrary shape [...]
      fs: (n,)        precomputed frequencies 2*pi/ws
      w:  (hidden, n) Linear weight
      b:  (hidden,)   Linear bias
      out_dtype: storage dtype of the result (accumulation is always f32).
    Returns:
      array of shape [..., hidden] with dtype out_dtype.
    """
    n = fs.shape[0]
    hidden = w.shape[0]
    assert w.shape == (hidden, n)
    assert b.shape == (hidden,)

    orig_shape = x.shape
    m = 1
    for d in orig_shape:
        m *= d

    # Lane-dense output: pad hidden to a multiple of 128 (unmasked vst stores).
    hidden_p = _round_up(hidden, 128)
    out_bytes = jnp.dtype(out_dtype).itemsize

    bm = _auto_block_m(m, n, hidden_p, out_bytes, block_m)
    grid = (pl.cdiv(m, bm),)        # ragged last block handled by Pallas

    x_row = jnp.reshape(x, (1, m)).astype(jnp.float32)     # (1, m)   dense DMA
    fs_col = fs.astype(jnp.float32)[:, None]               # (n, 1)
    wt = jnp.transpose(w.astype(jnp.float32))              # (n, hidden)
    b2d = b.astype(jnp.float32)[None, :]                   # (1, hidden)
    if hidden_p != hidden:
        wt = jnp.pad(wt, ((0, 0), (0, hidden_p - hidden)))
        b2d = jnp.pad(b2d, ((0, 0), (0, hidden_p - hidden)))

    out = pl.pallas_call(
        _sine_embedding_kernel,
        out_shape=jax.ShapeDtypeStruct((m, hidden_p), out_dtype),
        grid_spec=pltpu.PrefetchScalarGridSpec(
            num_scalar_prefetch=0,
            grid=grid,
            in_specs=[
                pl.BlockSpec((1, bm), lambda i: (0, i)),          # x row tile
                pl.BlockSpec((n, 1), lambda i: (0, 0)),           # fs   (resident)
                pl.BlockSpec((n, hidden_p), lambda i: (0, 0)),    # W^T  (resident)
                pl.BlockSpec((1, hidden_p), lambda i: (0, 0)),    # bias (resident)
            ],
            out_specs=pl.BlockSpec((bm, hidden_p), lambda i: (i, 0)),
        ),
        compiler_params=pltpu.CompilerParams(
            dimension_semantics=("parallel",),
            vmem_limit_bytes=32 * 1024 * 1024,
        ),
    )(x_row, fs_col, wt, b2d)

    if hidden_p != hidden:
        out = out[:, :hidden]
    return jnp.reshape(out, orig_shape + (hidden,))


def sine_embedding_ref(x, fs, w, b):
    """Pure-JAX reference mirroring the PyTorch forward."""
    s = jnp.sin(x[..., None] * fs)
    return s @ w.T + b


if __name__ == "__main__":
    key = jax.random.PRNGKey(0)
    k_x, k_w, k_b, k_x2, k_w2, k_b2 = jax.random.split(key, 6)
    w0, w1 = 0.001, 10.0  # module defaults, scale='log'

    # ---- main check: n=16, hidden=128, bf16 output, multi-step grid ----
    n, hidden = 16, 128
    batch, seq = 4, 64
    ws = jnp.exp(jnp.linspace(math.log(w0), math.log(w1), n))
    fs = (2.0 * math.pi / ws).astype(jnp.float32)
    w = jax.random.normal(k_w, (hidden, n), dtype=jnp.float32) / math.sqrt(n)
    b = jax.random.normal(k_b, (hidden,), dtype=jnp.float32)
    x = jax.random.uniform(k_x, (batch, seq), dtype=jnp.float32)

    out = jax.block_until_ready(sine_embedding(x, fs, w, b))
    ref = sine_embedding_ref(x, fs, w, b)
    assert out.shape == (batch, seq, hidden), out.shape
    assert out.dtype == jnp.bfloat16, out.dtype
    err = float(jnp.max(jnp.abs(out.astype(jnp.float32) - ref)))
    assert err < 8e-2, f"bf16 output mismatch vs reference, max abs err = {err}"

    # ---- secondary: hidden not a multiple of 128 (exercises lane padding),
    #      f32 output for a tight check ----
    n2, hidden2 = 8, 40
    ws2 = jnp.exp(jnp.linspace(math.log(w0), math.log(w1), n2))
    fs2 = (2.0 * math.pi / ws2).astype(jnp.float32)
    w2 = jax.random.normal(k_w2, (hidden2, n2), dtype=jnp.float32) / math.sqrt(n2)
    b2 = jax.random.normal(k_b2, (hidden2,), dtype=jnp.float32)
    x2 = jax.random.uniform(k_x2, (2, 8), dtype=jnp.float32)

    out2 = jax.block_until_ready(
        sine_embedding(x2, fs2, w2, b2, out_dtype=jnp.float32))
    ref2 = sine_embedding_ref(x2, fs2, w2, b2)
    assert out2.shape == (2, 8, hidden2), out2.shape
    assert jnp.allclose(out2, ref2, atol=5e-3, rtol=5e-3), (
        "f32 mismatch vs reference, max abs err = "
        f"{float(jnp.max(jnp.abs(out2 - ref2)))}")

    print("KERNEL_OK")
</pallas_src>

<mosaic_0001>
module attributes {stable_mosaic.version = 11 : i64} {
  func.func @_sine_embedding_kernel(%arg0: i32, %arg1: memref<1x128xf32, #tpu.memory_space<vmem>>, %arg2: memref<16x1xf32, #tpu.memory_space<vmem>>, %arg3: memref<16x128xf32, #tpu.memory_space<vmem>>, %arg4: memref<1x128xf32, #tpu.memory_space<vmem>>, %arg5: memref<128x128xbf16, #tpu.memory_space<vmem>>) attributes {dimension_semantics = [#tpu.dimension_semantics<parallel>], iteration_bounds = array<i64: 2>, scalar_prefetch = 0 : i64, scratch_operands = 0 : i64, tpu.core_type = #tpu.core_type<tc>, window_params = [{transform_indices = @transform_0, window_bounds = array<i64: 1, 128>}, {pipeline_mode = #tpu.pipeline_mode<synchronous>, transform_indices = @transform_1, window_bounds = array<i64: 16, 1>}, {pipeline_mode = #tpu.pipeline_mode<synchronous>, transform_indices = @transform_2, window_bounds = array<i64: 16, 128>}, {pipeline_mode = #tpu.pipeline_mode<synchronous>, transform_indices = @transform_3, window_bounds = array<i64: 1, 128>}, {transform_indices = @transform_4, window_bounds = array<i64: 128, 128>}]} {
    %c0 = arith.constant 0 : index
    %c0_0 = arith.constant 0 : index
    %0 = vector.load %arg1[%c0, %c0_0] : memref<1x128xf32, #tpu.memory_space<vmem>>, vector<1x128xf32>
    %c0_1 = arith.constant 0 : index
    %c0_2 = arith.constant 0 : index
    %1 = vector.load %arg2[%c0_1, %c0_2] : memref<16x1xf32, #tpu.memory_space<vmem>>, vector<16x1xf32>
    %2 = vector.broadcast %1 : vector<16x1xf32> to vector<16x128xf32>
    %3 = vector.broadcast %0 : vector<1x128xf32> to vector<16x128xf32>
    %4 = arith.mulf %2, %3 : vector<16x128xf32>
    %5 = math.sin %4 : vector<16x128xf32>
    %c0_3 = arith.constant 0 : index
    %c0_4 = arith.constant 0 : index
    %6 = vector.load %arg3[%c0_3, %c0_4] : memref<16x128xf32, #tpu.memory_space<vmem>>, vector<16x128xf32>
    %cst = arith.constant dense<0.000000e+00> : vector<128x128xf32>
    %7 = tpu.matmul %5, %6, %cst {dimension_numbers = #tpu.dot_dimension_numbers<[0], [0], [1], [1], [0, 1, 1, 1], [], []>} : vector<16x128xf32>, vector<16x128xf32>, vector<128x128xf32> -> vector<128x128xf32>
    %c0_5 = arith.constant 0 : index
    %c0_6 = arith.constant 0 : index
    %8 = vector.load %arg4[%c0_5, %c0_6] : memref<1x128xf32, #tpu.memory_space<vmem>>, vector<1x128xf32>
    %9 = vector.broadcast %8 : vector<1x128xf32> to vector<128x128xf32>
    %10 = arith.addf %7, %9 : vector<128x128xf32>
    %11 = arith.truncf %10 : vector<128x128xf32> to vector<128x128xbf16>
    %c0_7 = arith.constant 0 : index
    %c0_8 = arith.constant 0 : index
    %12 = vector.load %arg5[%c0_7, %c0_8] : memref<128x128xbf16, #tpu.memory_space<vmem>>, vector<128x128xbf16>
    tpu.vector_store %arg5[%c0_7, %c0_8], %11 {strides = array<i32>} : memref<128x128xbf16, #tpu.memory_space<vmem>>, vector<128x128xbf16>,
    return
  }
  func.func @transform_0(%arg0: i32) -> (i32, i32) {
    %c0_i32 = arith.constant 0 : i32
    %c0_i32_0 = arith.constant 0 : i32
    return %c0_i32, %arg0 : i32, i32
  }
  func.func @transform_1(%arg0: i32) -> (i32, i32) {
    %c0_i32 = arith.constant 0 : i32
    %c0_i32_0 = arith.constant 0 : i32
    %c0_i32_1 = arith.constant 0 : i32
    return %c0_i32, %c0_i32_0 : i32, i32
  }
  func.func @transform_2(%arg0: i32) -> (i32, i32) {
    %c0_i32 = arith.constant 0 : i32
    %c0_i32_0 = arith.constant 0 : i32
    %c0_i32_1 = arith.constant 0 : i32
    return %c0_i32, %c0_i32_0 : i32, i32
  }
  func.func @transform_3(%arg0: i32) -> (i32, i32) {
    %c0_i32 = arith.constant 0 : i32
    %c0_i32_0 = arith.constant 0 : i32
    %c0_i32_1 = arith.constant 0 : i32
    return %c0_i32, %c0_i32_0 : i32, i32
  }
  func.func @transform_4(%arg0: i32) -> (i32, i32) {
    %c0_i32 = arith.constant 0 : i32
    %c0_i32_0 = arith.constant 0 : i32
    return %arg0, %c0_i32 : i32, i32
  }
}

</mosaic_0001>

<bundles_post_ra>
// kernel: tpu_custom_call.1
= control target key start
LH: loop header
LB: loop body
LE: loop exit
PB: predicated region body
PF: predicated region fallthrough
CT: control target
= control target key end

     0   :  { %9 = vsyncpa [#allocation3], 0  ;;  %s1379_s0 = inlined_call_operand.vmem [shape: f32[1,256], index: 0, kind: input, shape index: {}]   ;;  %s1380_s1 = inlined_call_operand.vmem [shape: f32[16,1], index: 1, kind: input, shape index: {}]   ;;  %s1381_s2 = inlined_call_operand.vmem [shape: f32[16,128], index: 2, kind: input, shape index: {}]   ;;  %s1382_s3 = inlined_call_operand.vmem [shape: f32[1,128], index: 3, kind: input, shape index: {}]   ;;  %s1383_s4 = inlined_call_operand.hbm [shape: bf16[256,128], index: 4, kind: output, shape index: {}]  }
   0x1   :  { %11 = vsyncpa [#allocation3 + $0x1], 0  ;;  %s1141_s15 = smov 0   ;;  %s1143_s16 = smov 0  }
   0x2   :  { %s1145_s17 = smov 0   ;;  %s1147_s18 = smov 0  }
   0x3 LB: > { %s1162_s19 = sadd.s32 4294967295, %s1104_s18   ;;  %s808_s20 = sadd.s32 4294967294, %s1104_s18   ;;  %s1104_s18 = sphi %s1147_s18, %s1391_s18   ;;  %s1100_s17 = sphi %s1145_s17, %s1390_s17   ;;  %s1096_s16 = sphi %s1143_s16, %s1389_s16   ;;  %s1092_s15 = sphi %s1141_s15, %s1388_s15  }
   0x4   : > { %s1166_s21 = sadd.s32 1, %s1104_s18   ;;  %s113_s22 = sadd.s32 1, %s1100_s17 }
   0x5   : > { %s110_s23 = ssub.s32 %s1104_s18, %s1166_s21  ;;  %p123_p0 = scmp.ne.s32.totalorder %s1100_s17, %s1096_s16 }
   0x6   : > { %p111_p1 = scmp.eq.s32.totalorder %s110_s23, 0  ;;  %p124_p2 = scmp.eq.s32.totalorder %s1162_s19, 1 }
   0x7   : > { %p129_p3 = scmp.ne.s32.totalorder %s1096_s16, %s1092_s15  ;;  %p130_p4 = scmp.eq.s32.totalorder %s808_s20, 1 }
   0x8   : > { %s1177_s24 = scalar_select %p111_p1, %s1100_s17, %s113_s22  }
   0x9   : > { %p1179_p5 = por %p124_p2, %p123_p0  ;;  %p1183_p6 = por %p130_p4, %p129_p3 }
   0xa   : > { %p811_p7 = scmp.ge.s32.totalorder %s1104_s18, 1  ;;  %p163_p8 = scmp.lt.s32.totalorder %s1104_s18, 3 }
   0xc   : > { %p164_p9 = pnand %p811_p7, %p163_p8 }
   0xd   : > { %v192_v0 = vld [vmem:[%s1380_s1] sm:$0xff] (!%p164_p9)  ;;  %v1106_v1 = vmov (!%p164_p9), 0   ;;  %v193_v2 = vld [vmem:[%s1380_s1 + $0x8] sm:$0xff] (!%p164_p9)  ;;  %p187_p10 = scmp.lt.s32.totalorder (!%p164_p9), %s1162_s19, 1  ;;  %v1107_v26 = vmov (!%p164_p9), 2102212464  }
   0xe   : > { %167 = sbr.rel (%p164_p9) target bundleno = 653 (0x28d), region = 36  ;;  %1033 = vset.pattern.permute.xlu0 (!%p164_p9), %v1106_v1  ;;  %v1108_v28 = vmov (!%p164_p9), 920167782   ;;  %v1109_v32 = vmov (!%p164_p9), 1326507024   ;;  %s184_s13 = sand.u32 (!%p164_p9), 1, %s1096_s16  }
   0xf   : > { %196 = vperm.xlu0 (!%p164_p9), %1033, %v192_v0   ;;  %v1110_v36 = vmov (!%p164_p9), 683565275   ;;  %v1111_v38 = vmov (!%p164_p9), 2475754826   ;;  %v1112_v40 = vmov (!%p164_p9), 2131351028  }
  0x10   : > { %s812_s22 = sshll.u32 (!%p164_p9), %s184_s13, 6  ;;  %s876_s27 = sshll.u32 (!%p164_p9), %s1162_s19, 10 }
  0x11   : > { %s1317_s23 = scalar_lea.vmem (!%p164_p9), [#allocation2], %s812_s22  ;;  %s1338_s6 = scalar_lea.sflag (!%p164_p9), [#allocation3], %s184_s13 }
  0x12   : > { %s749_s28 = sshll.u32 (!%p164_p9), %s1317_s23, 4  ;;  %s1113_s7 = smov (!%p164_p9), [#allocation2]   ;;  %s1333_s28 = int_to_ptr.vmem [resolvable:$true] %s749_s28 }
  0x13   : > { %201 = vperm.xlu0 (!%p164_p9), %1033, %v193_v2  }
  0x15   : > { %s188_s5 = scalar_select %p187_p10, %s1162_s19, 1 }
  0x16   : > { %s1042_s19 = scalar_lea.vmem %s1333_s28, 1024 }
  0x17   : > { %s189_s8 = scalar_lea.vmem %s1379_s0, %s188_s5  ;;  %s1331_s5 = scalar_lea.hbm %s1383_s4, %s876_s27 }
  0x18   : > { %v813_v3 = vld [vmem:[%s189_s8] ss:$0 sm:$0xff]  ;;  %p1043_p11 = scmp.ne.s32.totalorder %s1333_s28, %s1042_s19  ;;  %s1046_s8 = sshll.u32 %s1113_s7, 4  ;;  %s1047_s8 = int_to_ptr.vmem [resolvable:$false] %s1046_s8 }
  0x19   : > { %s1048_s9 = scalar_lea.vmem %s1047_s8, 2048  ;;  %p1049_p0 = scmp.lt.s32.totalorder %s1333_s28, %s1047_s8 }
  0x1a   : > { %p1044_p12 = pnand %p1043_p11, %p1179_p5  ;;  %p1050_p1 = scmp.lt.s32.totalorder %s1048_s9, %s1042_s19 }
  0x1c   : > { %p1045_p13 = pneg %p1044_p12  ;;  %p1051_p2 = por %p1050_p1, %p1049_p0 }
  0x1e   : > { %p1052_p3 = pnand %p1051_p2, %p1045_p13 }
  0x8e   : > { %v197_v4 = vpop.permute.xlu0 %196 }
  0x8f   : > { %v1200_v5 = vmul.f32 %v813_v3, %v197_v4 }
  0x91   : > { %v215_v6 = vand.u32 2139095040, %v1200_v5  ;;  %v212_v7 = vand.u32 2147483647, %v1200_v5  ;;  %vm214_vm14 = vcmp.lt.s32.totalorder %v1200_v5, 0 }
  0x92   : > { %v202_v8 = vpop.permute.xlu0 %201 }
  0x93   : > { %v216_v9 = vshrl.u32 %v215_v6, 23  ;;  %v1204_v10 = vmul.f32 %v813_v3, %v202_v8  ;;  %v219_v13 = vand.u32 8388607, %v212_v7  ;;  %vm213_vm15 = vcmp.le.f32.partialorder %v212_v7, 0.7853982 }
  0x95   : > { %v814_v11 = vadd.s32 4294967169, %v216_v9  ;;  %v319_v12 = vand.u32 2139095040, %v1204_v10  ;;  %v316_v14 = vand.u32 2147483647, %v1204_v10  ;;  %v220_v18 = vor.u32 8388608, %v219_v13 }
  0x97   : > { %v222_v15 = vadd.s32 1, %v814_v11  ;;  %v320_v16 = vshrl.u32 %v319_v12, 23  ;;  %v1212_v20 = vand.u32 8388607, %v316_v14  ;;  %v1214_v25 = vshll.u32 %v220_v18, 8 }
  0x99   : > { %vm223_vm0 = vcmp.gt.s32.totalorder %v222_v15, 0  ;;  %v818_v17 = vadd.s32 4294967169, %v320_v16  ;;  %v324_v30 = vor.u32 8388608, %v1212_v20 }
  0x9a   : > { %v224_v19 = vsel %vm223_vm0, %v222_v15, 0  ;;  %vm318_vm0 = vcmp.lt.s32.totalorder %v1204_v10, 0 }
  0x9b   : > { %v225_v21 = vshrl.u32 %v224_v19, 5  ;;  %v226_v22 = vand.u32 31, %v224_v19  ;;  %v326_v23 = vadd.s32 1, %v818_v17 }
  0x9d   : > { %v227_v24 = vsub.s32 32, %v226_v22  ;;  %v238_v27 = vshll.u32 %v1107_v26, %v226_v22  ;;  %v241_v29 = vshll.u32 %v1108_v28, %v226_v22  ;;  %vm327_vm1 = vcmp.gt.s32.totalorder %v326_v23, 0 }
  0x9e   : > { %vm247_vm2 = vcmp.lt.s32.totalorder %v225_v21, 4  ;;  %v328_v34 = vsel %vm327_vm1, %v326_v23, 0  ;;  %v229_v37 = vshll.u32 %v1110_v36, %v226_v22  ;;  %v232_v44 = vshll.u32 %v1111_v38, %v226_v22 }
  0x9f   : > { %v239_v31 = vshrl.u32 %v1108_v28, %v227_v24  ;;  %v242_v33 = vshrl.u32 %v1109_v32, %v227_v24  ;;  %v330_v35 = vand.u32 31, %v328_v34  ;;  %v230_v39 = vshrl.u32 %v1111_v38, %v227_v24 }
  0xa0   : > { %v233_v41 = vshrl.u32 %v1112_v40, %v227_v24  ;;  %v236_v45 = vshrl.u32 %v1107_v26, %v227_v24  ;;  %v1218_v46 = vshrl.u32 %v328_v34, 5  ;;  %v235_v48 = vshll.u32 %v1112_v40, %v226_v22 }
  0xa1   : > { %v240_v42 = vor.u32 %v239_v31, %v238_v27  ;;  %v243_v43 = vor.u32 %v242_v33, %v241_v29  ;;  %v331_v47 = vsub.s32 32, %v330_v35  ;;  %vm244_vm3 = vcmp.lt.s32.totalorder %v225_v21, 1 }
  0xa2   : > { %v345_v50 = vshll.u32 %v1108_v28, %v330_v35  ;;  %v231_v51 = vor.u32 %v230_v39, %v229_v37  ;;  %v234_v52 = vor.u32 %v233_v41, %v232_v44  ;;  %v237_v56 = vor.u32 %v236_v45, %v235_v48 }
  0xa3   : > { %v253_v49 = vsel %vm247_vm2, %v240_v42, 920167782  ;;  %v257_v53 = vsel %vm247_vm2, %v243_v43, 1326507024  ;;  %v343_v54 = vshrl.u32 %v1108_v28, %v331_v47  ;;  %v346_v55 = vshrl.u32 %v1109_v32, %v331_v47 }
  0xa4   : > { %v342_v57 = vshll.u32 %v1107_v26, %v330_v35  ;;  %v228_v58 = vshrl.u32 %v1110_v36, %v227_v24  ;;  %vm246_vm4 = vcmp.lt.s32.totalorder %v225_v21, 3  ;;  %v252_v59 = vsel %vm244_vm3, %v231_v51, %v234_v52 }
  0xa5   : > { %v347_v60 = vor.u32 %v346_v55, %v345_v50  ;;  %vm245_vm5 = vcmp.lt.s32.totalorder %v225_v21, 2  ;;  %v249_v61 = vsel %vm247_vm2, %v237_v56, 2102212464  ;;  %v254_v62 = vsel %vm246_vm4, %v237_v56, %v253_v49 }
  0xa6   : > { %vm351_vm6 = vcmp.lt.s32.totalorder %v1218_v46, 4  ;;  %v255_v63 = vsel %vm245_vm5, %v252_v59, %v254_v62  ;;  %v256_v0 = vsel %vm244_vm3, %v234_v52, %v237_v56  ;;  %v258_v1 = vsel %vm246_vm4, %v240_v42, %v257_v53 }
  0xa7   : > { %v344_v2 = vor.u32 %v343_v54, %v342_v57  ;;  %v248_v3 = vsel %vm244_vm3, %v228_v58, %v231_v51  ;;  %v250_v4 = vsel %vm246_vm4, %v234_v52, %v249_v61  ;;  %v259_v6 = vsel %vm245_vm5, %v256_v0, %v258_v1 }
  0xa8   : > { %v1231_v8 = vmul.u32.u64.low %v1214_v25, %v259_v6  ;;  %v1232_v9 = vmul.u32.u64.high %v1214_v25, %v259_v6, %v1231_v8  ;;  %v1235_v11 = vmul.u32.u64.low %v1214_v25, %v255_v63  ;;  %v1236_v12 = vmul.u32.u64.high %v1214_v25, %v255_v63, %v1235_v11 }
  0xa9   : > { %v361_v13 = vsel %vm351_vm6, %v347_v60, 1326507024  ;;  %v333_v15 = vshll.u32 %v1110_v36, %v330_v35  ;;  %v334_v16 = vshrl.u32 %v1111_v38, %v331_v47  ;;  %v251_v17 = vsel %vm245_vm5, %v248_v3, %v250_v4 }
  0xaa   : > { %v336_v18 = vshll.u32 %v1111_v38, %v330_v35  ;;  %v337_v19 = vshrl.u32 %v1112_v40, %v331_v47  ;;  %v340_v20 = vshrl.u32 %v1107_v26, %v331_v47  ;;  %v357_v22 = vsel %vm351_vm6, %v344_v2, 920167782 }
  0xab   : > { %v335_v23 = vor.u32 %v334_v16, %v333_v15  ;;  %v339_v24 = vshll.u32 %v1112_v40, %v330_v35  ;;  %v364_v27 = vshll.u32 %v324_v30, 8  ;;  %vm269_vm7 = vc.u32 %v1232_v9, %v1235_v11 }
  0xac   : > { %v270_v28 = vadd.s32 1, %v1236_v12  ;;  %v338_v29 = vor.u32 %v337_v19, %v336_v18  ;;  %vm350_vm8 = vcmp.lt.s32.totalorder %v1218_v46, 3  ;;  %v267_v31 = vmul.u32 %v1214_v25, %v251_v17 }
  0xad   : > { %v341_v21 = vor.u32 %v340_v20, %v339_v24  ;;  %vm348_vm9 = vcmp.lt.s32.totalorder %v1218_v46, 1  ;;  %v362_v26 = vsel %vm350_vm8, %v344_v2, %v361_v13  ;;  %v332_v33 = vshrl.u32 %v1110_v36, %v331_v47 }
  0xae   : > { %v271_v32 = vsel %vm269_vm7, %v270_v28, %v1236_v12  ;;  %vm349_vm10 = vcmp.lt.s32.totalorder %v1218_v46, 2  ;;  %v356_v30 = vsel %vm348_vm9, %v335_v23, %v338_v29  ;;  %v268_v63 = vadd.s32 %v1235_v11, %v1232_v9 }
  0xaf   : > { %v272_v34 = vadd.s32 %v271_v32, %v267_v31  ;;  %v353_v35 = vsel %vm351_vm6, %v341_v21, 2102212464  ;;  %v358_v25 = vsel %vm350_vm8, %v341_v21, %v357_v22  ;;  %v360_v37 = vsel %vm348_vm9, %v338_v29, %v341_v21 }
  0xb0   : > { %v352_v38 = vsel %vm348_vm9, %v332_v33, %v335_v23  ;;  %v359_v39 = vsel %vm349_vm10, %v356_v30, %v358_v25  ;;  %v363_v40 = vsel %vm349_vm10, %v360_v37, %v362_v26  ;;  %v354_v42 = vsel %vm350_vm8, %v338_v29, %v353_v35 }
  0xb1   : > { %v273_v41 = vadd.s32 536870912, %v272_v34  ;;  %v1260_v43 = vmul.u32.u64.low %v364_v27, %v363_v40  ;;  %v1261_v36 = vmul.u32.u64.high %v364_v27, %v363_v40, %v1260_v43  ;;  %v355_v48 = vsel %vm349_vm10, %v352_v38, %v354_v42 }
  0xb2   : > { %v1263_v44 = vmul.u32.u64.low %v364_v27, %v359_v39  ;;  %v1264_v45 = vmul.u32.u64.high %v364_v27, %v359_v39, %v1263_v44  ;;  %v371_v52 = vmul.u32 %v364_v27, %v355_v48  ;;  %vm1278_vm1 = vcmp.le.f32.partialorder %v316_v14, 0.7853982 }
  0xb3   : > { %v274_v47 = vshrl.u32 %v273_v41, 30  ;;  %vm304_vm5 = vweird.f32 %v1200_v5  ;;  %vm408_vm9 = vweird.f32 %v1204_v10  ;;  %vm461_vm10 = vcmask 130048  }
  0xb4   : > { %vm373_vm11 = vc.u32 %v1261_v36, %v1263_v44  ;;  %v374_v50 = vadd.s32 1, %v1264_v45  ;;  %v372_v9 = vadd.s32 %v1263_v44, %v1261_v36 }
  0xb5   : > { %v275_v49 = vshll.u32 %v274_v47, 30  ;;  %v298_v22 = vsub.s32 4, %v274_v47 }
  0xb6   : > { %v375_v53 = vsel %vm373_vm11, %v374_v50, %v1264_v45 }
  0xb7   : > { %v276_v51 = vsub.s32 %v272_v34, %v275_v49  ;;  %v376_v46 = vadd.s32 %v375_v53, %v371_v52  ;;  %v299_v26 = vsel %vm214_vm14, %v298_v22, %v274_v47 }
  0xb8   : > { %v301_v34 = vsel %vm213_vm15, 0, %v299_v26 }
  0xb9   : > { %v278_v54 = vsub.s32 0, %v276_v51  ;;  %v377_v56 = vadd.s32 536870912, %v376_v46  ;;  %v305_v38 = vadd.s32 3, %v301_v34 }
  0xbb   : > { %v815_v55 = vmin.u32 %v278_v54, %v276_v51  ;;  %v378_v58 = vshrl.u32 %v377_v56, 30  ;;  %v306_v42 = vand.u32 3, %v305_v38 }
  0xbd   : > { %v280_v57 = vclz %v815_v55  ;;  %v379_v60 = vshll.u32 %v378_v58, 30  ;;  %v402_v40 = vsub.s32 4, %v378_v58  ;;  %vm311_vm2 = vcmp.eq.s32.totalorder %v306_v42, 2 }
  0xbe   : > { %vm308_vm3 = vcmp.eq.s32.totalorder %v306_v42, 0  ;;  %vm307_vm4 = vcmp.lt.s32.totalorder %v306_v42, 2 }
  0xbf   : > { %v816_v59 = vadd.s32 4294967294, %v280_v57  ;;  %v380_v62 = vsub.s32 %v376_v46, %v379_v60  ;;  %v403_v36 = vsel %vm318_vm0, %v402_v40, %v378_v58  ;;  %v420_v58 = vld [vmem:[%s1381_s2] sm:$0xff] }
  0xc0   : > { %v405_v50 = vsel %vm1278_vm1, 0, %v403_v36 }
  0xc1   : > { %vm817_vm12 = vcmp.lt.s32.totalorder %v816_v59, 0  ;;  %v382_v2 = vsub.s32 0, %v380_v62  ;;  %v409_v53 = vadd.s32 3, %v405_v50 }
  0xc2   : > { %v283_v61 = vsel %vm817_vm12, 0, %v816_v59  ;;  %v421_v59 = vld [vmem:[%s1381_s2 + $0x8] sm:$0xff] }
  0xc3   : > { %v284_v0 = vsub.s32 32, %v283_v61  ;;  %v288_v1 = vsub.s32 4294967266, %v283_v61  ;;  %v285_v3 = vshll.u32 %v276_v51, %v283_v61  ;;  %v819_v8 = vmin.u32 %v382_v2, %v380_v62 }
  0xc4   : > { %v410_v46 = vand.u32 3, %v409_v53  ;;  %v970_v61 = vpack.c.bf16 %v421_v59, %v420_v58 }
  0xc5   : > { %v286_v4 = vshrl.u32 %v268_v63, %v284_v0  ;;  %v289_v6 = vadd.s32 127, %v288_v1  ;;  %v384_v15 = vclz %v819_v8 }
  0xc6   : > { %vm415_vm6 = vcmp.eq.s32.totalorder %v410_v46, 2  ;;  %vm412_vm7 = vcmp.eq.s32.totalorder %v410_v46, 0  ;;  %vm411_vm8 = vcmp.lt.s32.totalorder %v410_v46, 2  ;;  %971 = vmatprep.subr.bf16.mxu0 %v970_v61  ;;  %974 = vmatprep.subr.bf16.mxu1 %v970_v61 }
  0xc7   : > { %v287_v12 = vor.u32 %v286_v4, %v285_v3  ;;  %v290_v13 = vshll.u32 %v289_v6, 23  ;;  %v820_v17 = vadd.s32 4294967294, %v384_v15  ;;  %973 = vmatpush3.bf16.msra.mxu0 %v970_v61  ;;  %975 = vmatpush3.bf16.msra.mxu1 %v970_v61 }
  0xc9   : > { %v291_v16 = vor.u32 4788187, %v290_v13  ;;  %v294_v19 = vcvt.s32.f32 %v287_v12  ;;  %vm821_vm13 = vcmp.lt.s32.totalorder %v820_v17, 0 }
  0xca   : > { %v387_v23 = vsel %vm821_vm13, 0, %v820_v17 }
  0xcb   : > { %v292_v18 = vand.u32 2147483647, %v291_v16  ;;  %v388_v11 = vsub.s32 32, %v387_v23  ;;  %v392_v24 = vsub.s32 4294967266, %v387_v23  ;;  %v389_v28 = vshll.u32 %v380_v62, %v387_v23  ;;  %v822_v23 = vld [vmem:[%s1382_s3] ss:$0 sm:$0xff] }
  0xcd   : > { %v295_v20 = vmul.f32 %v294_v19, %v292_v18  ;;  %v390_v29 = vshrl.u32 %v372_v9, %v388_v11  ;;  %v393_v31 = vadd.s32 127, %v392_v24 }
  0xcf   : > { %v296_v27 = vxor.u32 2147483648, %v295_v20  ;;  %v391_v33 = vor.u32 %v390_v29, %v389_v28  ;;  %v394_v30 = vshll.u32 %v393_v31, 23 }
  0xd1   : > { %v297_v21 = vsel %vm214_vm14, %v296_v27, %v295_v20  ;;  %v395_v35 = vor.u32 4788187, %v394_v30  ;;  %v398_v37 = vcvt.s32.f32 %v391_v33 }
  0xd2   : > { %v300_v32 = vsel %vm213_vm15, %v1200_v5, %v297_v21 }
  0xd3   : > { %1034 = vcosq.f32 %v300_v32  ;;  %v396_v25 = vand.u32 2147483647, %v395_v35 }
  0xd4   : > { %1036 = vsinq.f32 %v300_v32 }
  0xd5   : > { %v399_v39 = vmul.f32 %v398_v37, %v396_v25 }
  0xd7   : > { %v400_v41 = vxor.u32 2147483648, %v399_v39 }
  0xd9   : > { %v401_v43 = vsel %vm318_vm0, %v400_v41, %v399_v39 }
  0xda   : > { %v404_v45 = vsel %vm1278_vm1, %v1204_v10, %v401_v43 }
  0xdb   : > { %1038 = vcosq.f32 %v404_v45 }
  0xdc   : > { %1040 = vsinq.f32 %v404_v45 }
  0xdd   : > { %v1035_v44 = vpop.eup %1034 }
  0xde   : > { %v1037_v47 = vpop.eup %1036  ;;  %v312_v48 = vxor.u32 2147483648, %v1035_v44 }
  0xdf   : > { %v309_v49 = vxor.u32 2147483648, %v1037_v47 }
  0xe0   : > { %v313_v14 = vsel %vm311_vm2, %v312_v48, %v1037_v47 }
  0xe1   : > { %v310_v51 = vsel %vm308_vm3, %v1035_v44, %v309_v49 }
  0xe2   : > { %v314_v52 = vsel %vm307_vm4, %v310_v51, %v313_v14 }
  0xe3   : > { %v315_v54 = vsel %vm304_vm5, nan, %v314_v52 }
  0xe4   : > { %429 = vxpose.xlu1.b32.start [1/2] (short) %v315_v54, 128 }
  0xe5   : > { %v1039_v55 = vpop.eup %1038 }
  0xe6   : > { %v1041_v56 = vpop.eup %1040  ;;  %v416_v57 = vxor.u32 2147483648, %v1039_v55 }
  0xe7   : > { %v413_v60 = vxor.u32 2147483648, %v1041_v56 }
  0xe8   : > { %v417_v5 = vsel %vm415_vm6, %v416_v57, %v1041_v56 }
  0xe9   : > { %v414_v62 = vsel %vm412_vm7, %v1039_v55, %v413_v60 }
  0xea   : > { %v418_v63 = vsel %vm411_vm8, %v414_v62, %v417_v5 }
  0xeb   : > { %v419_v0 = vsel %vm408_vm9, nan, %v418_v63 }
  0xec   : > { %430 = vxpose.xlu1.b32.end [2/2] (short) %v419_v0, 128 }
 0x168   : > { %v445_v1 = vpop.trf.xlu1 }
 0x169   : > { %946 = vmatprep.mubr.msk.f32.mxu0 %vm461_vm10, %v445_v1 }
 0x16c   : > { %v446_v2 = vpop.trf.xlu1 }
 0x16d   : > { %947 = vmatmul.mubr.msk.f32.vlgmr.msra.gmra.mrb[0].mxu0 %vm461_vm10, %v446_v2 }
 0x170   : > { %v447_v3 = vpop.trf.xlu1 }
 0x171   : > { %949 = vmatprep.mubr.msk.f32.mxu0 %vm461_vm10, %v447_v3 }
 0x174   : > { %v448_v4 = vpop.trf.xlu1 }
 0x175   : > { %950 = vmatmul.mubr.msk.f32.gmra.mrb[2].mxu0 %vm461_vm10, %v448_v4 }
 0x178   : > { %v449_v6 = vpop.trf.xlu1 }
 0x179   : > { %952 = vmatprep.mubr.msk.f32.mxu0 %vm461_vm10, %v449_v6 }
 0x17c   : > { %v450_v10 = vpop.trf.xlu1 }
 0x17d   : > { %953 = vmatmul.mubr.msk.f32.gmra.mrb[4].mxu0 %vm461_vm10, %v450_v10 }
 0x180   : > { %v451_v8 = vpop.trf.xlu1 }
 0x181   : > { %955 = vmatprep.mubr.msk.f32.mxu0 %vm461_vm10, %v451_v8 }
 0x184   : > { %v452_v12 = vpop.trf.xlu1 }
 0x185   : > { %956 = vmatmul.mubr.msk.f32.gmra.mrb[6].mxu0 %vm461_vm10, %v452_v12 }
 0x188   : > { %v453_v13 = vpop.trf.xlu1 }
 0x189   : > { %958 = vmatprep.mubr.msk.f32.mxu1 %vm461_vm10, %v453_v13 }
 0x18c   : > { %v454_v15 = vpop.trf.xlu1 }
 0x18d   : > { %959 = vmatmul.mubr.msk.f32.vlgmr.msra.gmra.mrb[0].mxu1 %vm461_vm10, %v454_v15 }
 0x190   : > { %v455_v16 = vpop.trf.xlu1 }
 0x191   : > { %961 = vmatprep.mubr.msk.f32.mxu1 %vm461_vm10, %v455_v16 }
 0x194   : > { %v456_v17 = vpop.trf.xlu1 }
 0x195   : > { %962 = vmatmul.mubr.msk.f32.gmra.mrb[2].mxu1 %vm461_vm10, %v456_v17 }
 0x198   : > { %v457_v18 = vpop.trf.xlu1 }
 0x199   : > { %964 = vmatprep.mubr.msk.f32.mxu1 %vm461_vm10, %v457_v18 }
 0x19c   : > { %v458_v19 = vpop.trf.xlu1 }
 0x19d   : > { %965 = vmatmul.mubr.msk.f32.gmra.mrb[4].mxu1 %vm461_vm10, %v458_v19 }
 0x1a0   : > { %v459_v20 = vpop.trf.xlu1 }
 0x1a1   : > { %967 = vmatprep.mubr.msk.f32.mxu1 %vm461_vm10, %v459_v20 }
 0x1a4   : > { %v460_v22 = vpop.trf.xlu1 }
 0x1a5   : > { %968 = vmatmul.mubr.msk.f32.gmra.mrb[6].mxu1 %vm461_vm10, %v460_v22 }
 0x240   : > { %v948_v9 = vpop.f32.mrb[0].mxu0 }
 0x241   : > { %v582_v11 = vadd.f32 %v948_v9, %v822_v23  ;;  %v576_v24 = vpop.f32.mrb[1].mxu0 }
 0x242   : > { %v577_v27 = vadd.f32 %v822_v23, %v576_v24 }
 0x244   : > { %v880_v28 = vpack.c.bf16 %v582_v11, %v577_v27 }
 0x246   : > { %881 = vst [vmem:[%s1317_s23] sm:$0xff] %v880_v28  }
 0x248   : > { %v951_v29 = vpop.f32.mrb[2].mxu0 }
 0x249   : > { %v592_v31 = vadd.f32 %v951_v29, %v822_v23  ;;  %v586_v21 = vpop.f32.mrb[3].mxu0 }
 0x24a   : > { %v587_v26 = vadd.f32 %v822_v23, %v586_v21 }
 0x24c   : > { %v885_v32 = vpack.c.bf16 %v592_v31, %v587_v26 }
 0x24e   : > { %917 = vst [vmem:[%s1317_s23 + $0x8] sm:$0xff] %v885_v32  }
 0x250   : > { %v954_v33 = vpop.f32.mrb[4].mxu0 }
 0x251   : > { %v602_v30 = vadd.f32 %v954_v33, %v822_v23  ;;  %v596_v34 = vpop.f32.mrb[5].mxu0 }
 0x252   : > { %v597_v35 = vadd.f32 %v822_v23, %v596_v34 }
 0x254   : > { %v890_v25 = vpack.c.bf16 %v602_v30, %v597_v35 }
 0x256   : > { %918 = vst [vmem:[%s1317_s23 + $0x10] sm:$0xff] %v890_v25  }
 0x258   : > { %v957_v37 = vpop.f32.mrb[6].mxu0 }
 0x259   : > { %v612_v38 = vadd.f32 %v957_v37, %v822_v23  ;;  %v606_v39 = vpop.f32.mrb[7].mxu0 }
 0x25a   : > { %v607_v40 = vadd.f32 %v822_v23, %v606_v39 }
 0x25c   : > { %v895_v41 = vpack.c.bf16 %v612_v38, %v607_v40 }
 0x25e   : > { %919 = vst [vmem:[%s1317_s23 + $0x18] sm:$0xff] %v895_v41  }
 0x260   : > { %v960_v42 = vpop.f32.mrb[0].mxu1 }
 0x261   : > { %v622_v7 = vadd.f32 %v960_v42, %v822_v23  ;;  %v616_v43 = vpop.f32.mrb[1].mxu1 }
 0x262   : > { %v617_v36 = vadd.f32 %v822_v23, %v616_v43 }
 0x264   : > { %v900_v44 = vpack.c.bf16 %v622_v7, %v617_v36 }
 0x266   : > { %920 = vst [vmem:[%s1317_s23 + $0x20] sm:$0xff] %v900_v44  }
 0x268   : > { %v963_v45 = vpop.f32.mrb[2].mxu1 }
 0x269   : > { %v632_v47 = vadd.f32 %v963_v45, %v822_v23  ;;  %v626_v48 = vpop.f32.mrb[3].mxu1 }
 0x26a   : > { %v627_v49 = vadd.f32 %v822_v23, %v626_v48 }
 0x26c   : > { %v905_v50 = vpack.c.bf16 %v632_v47, %v627_v49 }
 0x26e   : > { %921 = vst [vmem:[%s1317_s23 + $0x28] sm:$0xff] %v905_v50  }
 0x270   : > { %v966_v14 = vpop.f32.mrb[4].mxu1 }
 0x271   : > { %v642_v51 = vadd.f32 %v966_v14, %v822_v23  ;;  %v636_v52 = vpop.f32.mrb[5].mxu1 }
 0x272   : > { %v637_v53 = vadd.f32 %v822_v23, %v636_v52 }
 0x274   : > { %v910_v54 = vpack.c.bf16 %v642_v51, %v637_v53 }
 0x276   : > { %922 = vst [vmem:[%s1317_s23 + $0x30] sm:$0xff] %v910_v54  }
 0x278   : > { %v969_v46 = vpop.f32.mrb[6].mxu1 }
 0x279   : > { %v652_v55 = vadd.f32 %v969_v46, %v822_v23  ;;  %v646_v56 = vpop.f32.mrb[7].mxu1 }
 0x27a   : > { %v647_v57 = vadd.f32 %v822_v23, %v646_v56 }
 0x27c   : > { %v915_v58 = vpack.c.bf16 %v652_v55, %v647_v57 }
 0x27e   : > { %923 = vst [vmem:[%s1317_s23 + $0x38] sm:$0xff] %v915_v58  }
 0x27f   : > { %1055 = shalt.err (!%p1052_p3)
}
 0x280   : > { %s1056_s10 = scalar_lea.hbm %s1331_s5, 1024  ;;  %s1060_s13 = scalar_lea.hbm %s1383_s4, 2048 }
 0x281   : > { %p1057_p4 = scmp.ne.s32.totalorder %s1331_s5, %s1056_s10  ;;  %p1061_p9 = scmp.lt.u32.totalorder %s1331_s5, %s1383_s4 }
 0x282   : > { %p1062_p10 = scmp.lt.u32.totalorder %s1060_s13, %s1056_s10  ;;  %p1064_p12 = scmp.lt.u32.totalorder %s1056_s10, %s1331_s5 }
 0x283   : > { %p1058_p7 = pnand %p1057_p4, %p1179_p5 }
 0x284   : > { %p1063_p11 = por %p1062_p10, %p1061_p9 }
 0x285   : > { %p1059_p8 = pneg %p1058_p7 }
 0x286   : > { %p1065_p13 = por %p1064_p12, %p1063_p11 }
 0x288   : > { %p1066_p0 = pnand %p1065_p13, %p1059_p8 }
 0x28a   : > { %1069 = shalt.err (!%p1066_p0)
}
 0x28b   : > { %s1114_s22 = smov 64   ;;  %s1115_s23 = smov 4  }
 0x28c   : > { %984 = dma.vmem_to_hbm [thread:$0]  (%p1179_p5), %s1333_s28, 1024, %s1331_s5, %s1338_s6, %s1114_s22, %s1114_s22, %s1115_s23  }
 0x28d PF: > { %p990_p1 = scmp.ge.s32.totalorder %s1104_s18, 2  ;;  %s764_s27 = sand.u32 1, %s1092_s15  }
 0x28e   : > { %s765_s29 = scalar_lea.sflag [#allocation3], %s764_s27 }
 0x28f   : > { %p987_p2 = pnand %p990_p1, %p1183_p6 }
 0x291   : > { %1087 = dma.done.wait (!%p987_p2), %s765_s29, 1024  }
 0x292   : > { %1089 = vsyncadd (!%p987_p2), %s765_s29, 4294966272  ;;  %p14_p3 = scmp.ge.s32.totalorder %s1166_s21, 4   ;;  %s1388_s15 = smov %s1096_s16 }
 0x293   : > { %s1389_s16 = smov %s1100_s17  ;;  %s1390_s17 = smov %s1177_s24 }
 0x294   : > { %s1391_s18 = smov %s1166_s21  ;;  %16 = sbr.rel (!%p14_p3) target bundleno = 3 (0x3), region = 71 }
 0x29b   :  { %770 = vsyncpa [#allocation3], 1 }
 0x29c   :  { %772 = vsyncpa [#allocation3 + $0x1], 1 }

</bundles_post_ra>
